<compile_context>
chip_gen: v6e
topology: v6e:2x2x1
jax: 0.10.0
libtpu: 0.0.40
codegen_flags: <defaults>
</compile_context>

<pallas_src>
import jax
import jax.numpy as jnp
from jax.experimental import pallas as pl
from jax.experimental.pallas import tpu as pltpu

IN_FEATURES = 120          # K: 15 full (8-row) sublane groups, no padding needed
OUT_FEATURES = 84          # logical N (output written exactly this wide)
N_PAD = 128                # weight/bias lane-padded so the MXU feed is aligned

_MEGACORE_MIN_ROWS = 512   # past this, keep an even >=2-step grid (v7x megacore)
_SMALL_BATCH_ROWS = 256    # below this, XLA's fused matmul+bias+relu wins


def _round_up(v, m):
    return ((v + m - 1) // m) * m


def _choose_tiling(B, max_tile_rows):
    """Pick a batch tile that (nearly) divides B (pad <= TB-1 rows)."""
    nblk = max(1, pl.cdiv(B, max_tile_rows))
    if B >= _MEGACORE_MIN_ROWS:
        # v7x has 2 TensorCores: keep an even, >=2-step grid so the "parallel"
        # batch axis can actually be sharded. Harmless on v5e/v6e (single TC).
        nblk = max(nblk, 2)
        nblk += nblk % 2
    TB = _round_up(pl.cdiv(B, nblk), 8)
    Bp = _round_up(B, TB)
    return TB, Bp


def _fc_relu_kernel(x_ref, wt_ref, b_ref, o_ref):
    # x_ref: (TB, 120)  wt_ref: (120, 128)  b_ref: (1, 128)  o_ref: (TB, 84)
    acc = jnp.dot(x_ref[...], wt_ref[...],
                  preferred_element_type=jnp.float32)     # MXU, f32 accumulate
    acc = jnp.maximum(acc + b_ref[...], 0.0)              # bias + ReLU (VPU)
    o_ref[...] = acc[:, :OUT_FEATURES].astype(o_ref.dtype)


def prepare_layer5_params(weight, bias):
    """One-time parameter prep (outside the hot path).

    weight: (84, 120) -> transposed + N-zero-padded (120, 128)
    bias:   (84,)     -> zero-padded (1, 128)
    """
    wt = jnp.zeros((IN_FEATURES, N_PAD), weight.dtype)
    wt = wt.at[:, :OUT_FEATURES].set(weight.T)
    b2 = jnp.zeros((1, N_PAD), bias.dtype)
    b2 = b2.at[0, :OUT_FEATURES].set(bias)
    return wt, b2


def layer5_forward(x, wt_pad, b_pad, *, max_tile_rows=2048,
                   min_pallas_rows=_SMALL_BATCH_ROWS):
    """x: (B, 120) f32; wt_pad: (120, 128); b_pad: (1, 128) -> (B, 84) f32."""
    B = x.shape[0]

    if B < min_pallas_rows:
        # Small-batch path: pallas_call launch + step overhead dominates a
        # ~20 KFLOP/row problem; XLA's fused matmul+bias+relu is at the floor.
        return jnp.maximum(
            x @ wt_pad[:, :OUT_FEATURES] + b_pad[0, :OUT_FEATURES], 0.0)

    TB, Bp = _choose_tiling(B, max_tile_rows)
    # Row-pad only when TB does not divide B. Padded output rows hold
    # relu(bias) != 0, so the [:B] row slice below must be kept.
    xp = x if Bp == B else jnp.zeros((Bp, IN_FEATURES), x.dtype).at[:B].set(x)

    out = pl.pallas_call(
        _fc_relu_kernel,
        out_shape=jax.ShapeDtypeStruct((Bp, OUT_FEATURES), x.dtype),
        grid_spec=pltpu.PrefetchScalarGridSpec(
            num_scalar_prefetch=0,
            grid=(Bp // TB,),
            in_specs=[
                # x tile: last dim 120 == full array dim, so no K-pad needed.
                pl.BlockSpec((TB, IN_FEATURES), lambda i: (i, 0)),
                # W / bias: constant index_map -> DMA'd once, kept resident
                # (blocks whose index doesn't change are not re-copied; the
                # duplicate default pipeline buffer is only ~64 KiB).
                pl.BlockSpec((IN_FEATURES, N_PAD), lambda i: (0, 0)),
                pl.BlockSpec((1, N_PAD), lambda i: (0, 0)),
            ],
            out_specs=pl.BlockSpec((TB, OUT_FEATURES), lambda i: (i, 0)),
        ),
        compiler_params=pltpu.CompilerParams(
            dimension_semantics=("parallel",)),   # megacore-shard batch on v7x
    )(xp, wt_pad, b_pad)

    return out if Bp == B else out[:B]


if __name__ == "__main__":
    key = jax.random.PRNGKey(0)
    kx1, kx2, kw, kb = jax.random.split(key, 4)

    # Deterministic synthetic parameters (mimic nn.Linear init ranges).
    bound = 1.0 / (IN_FEATURES ** 0.5)
    weight = jax.random.uniform(kw, (OUT_FEATURES, IN_FEATURES),
                                minval=-bound, maxval=bound, dtype=jnp.float32)
    bias = jax.random.uniform(kb, (OUT_FEATURES,),
                              minval=-bound, maxval=bound, dtype=jnp.float32)
    wt_pad, b_pad = prepare_layer5_params(weight, bias)

    fwd = jax.jit(layer5_forward,
                  static_argnames=("max_tile_rows", "min_pallas_rows"))

    # Small batch, forced through the Pallas kernel (grid=(1,)).
    x_small = jax.random.normal(kx1, (8, IN_FEATURES), dtype=jnp.float32)
    out_small = jax.block_until_ready(fwd(x_small, wt_pad, b_pad,
                                          min_pallas_rows=0))

    # Larger batch: exercises the tiled, 2-step "parallel" grid path.
    x_large = jax.random.normal(kx2, (640, IN_FEATURES), dtype=jnp.float32)
    out_large = jax.block_until_ready(fwd(x_large, wt_pad, b_pad))

    for x_, out_ in ((x_small, out_small), (x_large, out_large)):
        ref = jnp.maximum(x_ @ weight.T + bias, 0.0)
        assert out_.shape == (x_.shape[0], OUT_FEATURES)
        assert jnp.allclose(out_, ref, atol=1e-5, rtol=1e-5), "mismatch vs ref"

    print("KERNEL_OK")
</pallas_src>

<mosaic_0001>
module attributes {stable_mosaic.version = 11 : i64} {
  func.func @_fc_relu_kernel(%arg0: i32, %arg1: memref<8x120xf32, #tpu.memory_space<vmem>>, %arg2: memref<120x128xf32, #tpu.memory_space<vmem>>, %arg3: memref<1x128xf32, #tpu.memory_space<vmem>>, %arg4: memref<8x84xf32, #tpu.memory_space<vmem>>) attributes {dimension_semantics = [#tpu.dimension_semantics<parallel>], iteration_bounds = array<i64: 1>, scalar_prefetch = 0 : i64, scratch_operands = 0 : i64, tpu.core_type = #tpu.core_type<tc>, window_params = [{transform_indices = @transform_0, window_bounds = array<i64: 8, 120>}, {pipeline_mode = #tpu.pipeline_mode<synchronous>, transform_indices = @transform_1, window_bounds = array<i64: 120, 128>}, {pipeline_mode = #tpu.pipeline_mode<synchronous>, transform_indices = @transform_2, window_bounds = array<i64: 1, 128>}, {transform_indices = @transform_3, window_bounds = array<i64: 8, 84>}]} {
    %c0 = arith.constant 0 : index
    %c0_0 = arith.constant 0 : index
    %0 = vector.load %arg1[%c0, %c0_0] : memref<8x120xf32, #tpu.memory_space<vmem>>, vector<8x120xf32>
    %c0_1 = arith.constant 0 : index
    %c0_2 = arith.constant 0 : index
    %1 = vector.load %arg2[%c0_1, %c0_2] : memref<120x128xf32, #tpu.memory_space<vmem>>, vector<120x128xf32>
    %cst = arith.constant dense<0.000000e+00> : vector<8x128xf32>
    %2 = tpu.matmul %0, %1, %cst {dimension_numbers = #tpu.dot_dimension_numbers<[1], [0], [0], [1], [0, 0, 1, 1], [], []>} : vector<8x120xf32>, vector<120x128xf32>, vector<8x128xf32> -> vector<8x128xf32>
    %c0_3 = arith.constant 0 : index
    %c0_4 = arith.constant 0 : index
    %3 = vector.load %arg3[%c0_3, %c0_4] : memref<1x128xf32, #tpu.memory_space<vmem>>, vector<1x128xf32>
    %4 = vector.broadcast %3 : vector<1x128xf32> to vector<8x128xf32>
    %5 = arith.addf %2, %4 : vector<8x128xf32>
    %cst_5 = arith.constant 0.000000e+00 : f32
    %6 = vector.broadcast %cst_5 : f32 to vector<8x128xf32>
    %7 = arith.maximumf %5, %6 : vector<8x128xf32>
    %8 = vector.extract_strided_slice %7 {offsets = [0, 0], sizes = [8, 84], strides = [1, 1]} : vector<8x128xf32> to vector<8x84xf32>
    %c0_6 = arith.constant 0 : index
    %c0_7 = arith.constant 0 : index
    %9 = vector.load %arg4[%c0_6, %c0_7] : memref<8x84xf32, #tpu.memory_space<vmem>>, vector<8x84xf32>
    tpu.vector_store %arg4[%c0_6, %c0_7], %8 {strides = array<i32>} : memref<8x84xf32, #tpu.memory_space<vmem>>, vector<8x84xf32>,
    return
  }
  func.func @transform_0(%arg0: i32) -> (i32, i32) {
    %c0_i32 = arith.constant 0 : i32
    %c0_i32_0 = arith.constant 0 : i32
    return %arg0, %c0_i32 : i32, i32
  }
  func.func @transform_1(%arg0: i32) -> (i32, i32) {
    %c0_i32 = arith.constant 0 : i32
    %c0_i32_0 = arith.constant 0 : i32
    %c0_i32_1 = arith.constant 0 : i32
    return %c0_i32, %c0_i32_0 : i32, i32
  }
  func.func @transform_2(%arg0: i32) -> (i32, i32) {
    %c0_i32 = arith.constant 0 : i32
    %c0_i32_0 = arith.constant 0 : i32
    %c0_i32_1 = arith.constant 0 : i32
    return %c0_i32, %c0_i32_0 : i32, i32
  }
  func.func @transform_3(%arg0: i32) -> (i32, i32) {
    %c0_i32 = arith.constant 0 : i32
    %c0_i32_0 = arith.constant 0 : i32
    return %arg0, %c0_i32 : i32, i32
  }
}

</mosaic_0001>

<bundles_post_ra>
// kernel: layer5_forward.1
= control target key start
LH: loop header
LB: loop body
LE: loop exit
PB: predicated region body
PF: predicated region fallthrough
CT: control target
= control target key end

     0   :  { %8 = vsyncpa [#allocation3], 0  ;;  %s320_s0 = inlined_call_operand.hbm [shape: f32[8,120], index: 0, kind: input, shape index: {}]   ;;  %s321_s1 = inlined_call_operand.hbm [shape: f32[120,128], index: 1, kind: input, shape index: {}]   ;;  %s322_s2 = inlined_call_operand.vmem [shape: f32[1,128], index: 2, kind: input, shape index: {}]   ;;  %s323_s3 = inlined_call_operand.hbm [shape: f32[8,84], index: 3, kind: output, shape index: {}]  }
   0x1   :  { %9 = vsyncpa [#allocation6], 0 }
   0x2   :  { %10 = vsyncpa [#allocation4], 0  ;;  %s281_s12 = smov [#allocation2]   ;;  %s282_s14 = smov [#allocation5]  }
   0x3   :  { %s17_s13 = sshll.u32 %s281_s12, 4  ;;  %s26_s15 = sshll.u32 %s282_s14, 4  ;;  %s18_s13 = int_to_ptr.vmem [resolvable:$true] %s17_s13  ;;  %s27_s15 = int_to_ptr.vmem [resolvable:$true] %s26_s15 }
   0x4   :  { %s223_s16 = scalar_lea.vmem %s18_s13, 128  ;;  %p228_p1 = scmp.lt.s32.totalorder %s18_s13, %s18_s13 }
   0x5   :  { %p224_p0 = scmp.ne.s32.totalorder %s18_s13, %s223_s16  ;;  %p229_p2 = scmp.lt.s32.totalorder %s223_s16, %s223_s16 }
   0x7   :  { %p230_p3 = por %p229_p2, %p228_p1 }
   0x9   :  { %p231_p4 = pnand %p230_p3, %p224_p0 }
   0xb   :  { %234 = shalt.err (!%p231_p4)
}
   0xc   :  { %20 = dma.hbm_to_vmem [thread:$0]  %s320_s0, 128, %s18_s13, [#allocation3]  }
   0xd   :  { %s243_s19 = scalar_lea.vmem %s27_s15, 1920  ;;  %p248_p6 = scmp.lt.s32.totalorder %s27_s15, %s27_s15 }
   0xe   :  { %p244_p5 = scmp.ne.s32.totalorder %s27_s15, %s243_s19  ;;  %p249_p7 = scmp.lt.s32.totalorder %s243_s19, %s243_s19 }
  0x10   :  { %p250_p8 = por %p249_p7, %p248_p6 }
  0x12   :  { %p251_p9 = pnand %p250_p8, %p244_p5 }
  0x14   :  { %254 = shalt.err (!%p251_p9)
}
  0x15   :  { %s283_s20 = smov 128   ;;  %s284_s21 = smov 8  }
  0x16   :  { %32 = dma.hbm_to_vmem [thread:$0]  %s321_s1, 1920, %s27_s15, [#allocation6], %s283_s20, %s283_s20, %s284_s21  }
  0x17   :  { %275 = dma.done.wait [#allocation3], 128  }
  0x18   :  { %276 = vsyncadd [#allocation3], 4294967168 }
  0x19   :  { %277 = dma.done.wait [#allocation6], 1920  }
  0x1a   :  { %278 = vsyncadd [#allocation6], 4294965376  ;;  %v285_v0 = vmov 0.0   ;;  %vm286_vm0 = vmmov 0   ;;  %v56_v1 = vld [vmem:[#allocation5 + $0x70] sm:$0xff]  ;;  %v55_v2 = vld [vmem:[#allocation5 + $0x68] sm:$0xff] }
  0x1b   :  { %175 = vmatprep.subr.mxu0 %v285_v0  ;;  %205 = vmatprep.mubr.msk.f32.mxu0 %vm286_vm0, %v285_v0  ;;  %v54_v3 = vld [vmem:[#allocation5 + $0x60] sm:$0xff]  ;;  %v53_v4 = vld [vmem:[#allocation5 + $0x58] sm:$0xff]  ;;  %v52_v5 = vld [vmem:[#allocation5 + $0x50] sm:$0xff]  ;;  %vm64_vm1 = vcmask 982016   ;;  %s287_s24 = smov [#allocation7]   ;;  %vm139_vm2 = vcmask 687104  }
  0x1c   :  { %176 = vmatpush3.msra.mxu0 %v56_v1  ;;  %v51_v6 = vld [vmem:[#allocation5 + $0x48] sm:$0xff]  ;;  %v50_v7 = vld [vmem:[#allocation5 + $0x40] sm:$0xff]  ;;  %v49_v8 = vld [vmem:[#allocation5 + $0x38] sm:$0xff]  ;;  %s147_s25 = sshll.u32 %s287_s24, 4  ;;  %s148_s25 = int_to_ptr.vmem [resolvable:$true] %s147_s25 }
  0x1d   :  { %177 = vmatprep.subr.mxu0 %v285_v0  ;;  %v48_v9 = vld [vmem:[#allocation5 + $0x30] sm:$0xff]  ;;  %v47_v10 = vld [vmem:[#allocation5 + $0x28] sm:$0xff]  ;;  %v46_v11 = vld [vmem:[#allocation5 + $0x20] sm:$0xff]  ;;  %s255_s26 = scalar_lea.vmem %s148_s25, 128  ;;  %p260_p11 = scmp.lt.s32.totalorder %s148_s25, %s148_s25 }
  0x1e   :  { %178 = vmatpush3.msra.mxu0 %v55_v2  ;;  %v45_v12 = vld [vmem:[#allocation5 + $0x18] sm:$0xff]  ;;  %v44_v13 = vld [vmem:[#allocation5 + $0x10] sm:$0xff]  ;;  %v43_v14 = vld [vmem:[#allocation5 + $0x8] sm:$0xff]  ;;  %p256_p10 = scmp.ne.s32.totalorder %s148_s25, %s255_s26  ;;  %p261_p12 = scmp.lt.s32.totalorder %s255_s26, %s255_s26 }
  0x1f   :  { %179 = vmatprep.subr.mxu0 %v285_v0  ;;  %v42_v15 = vld [vmem:[#allocation5] sm:$0xff]  ;;  %v41_v16 = vld [vmem:[#allocation2] sm:$0xff] }
  0x20   :  { %180 = vmatpush3.msra.mxu0 %v54_v3  ;;  %v157_v17 = vld [vmem:[%s322_s2] ss:$0 sm:$0xff]  ;;  %p262_p13 = por %p261_p12, %p260_p11 }
  0x21   :  { %181 = vmatprep.subr.mxu0 %v285_v0 }
  0x22   :  { %182 = vmatpush3.msra.mxu0 %v53_v4  ;;  %p263_p0 = pnand %p262_p13, %p256_p10 }
  0x23   :  { %183 = vmatprep.subr.mxu0 %v285_v0 }
  0x24   :  { %184 = vmatpush3.msra.mxu0 %v52_v5 }
  0x25   :  { %185 = vmatprep.subr.mxu0 %v285_v0 }
  0x26   :  { %186 = vmatpush3.msra.mxu0 %v51_v6 }
  0x27   :  { %187 = vmatprep.subr.mxu0 %v285_v0 }
  0x28   :  { %188 = vmatpush3.msra.mxu0 %v50_v7 }
  0x29   :  { %189 = vmatprep.subr.mxu0 %v285_v0 }
  0x2a   :  { %190 = vmatpush3.msra.mxu0 %v49_v8 }
  0x2b   :  { %191 = vmatprep.subr.mxu0 %v285_v0 }
  0x2c   :  { %192 = vmatpush3.msra.mxu0 %v48_v9 }
  0x2d   :  { %193 = vmatprep.subr.mxu0 %v285_v0 }
  0x2e   :  { %194 = vmatpush3.msra.mxu0 %v47_v10 }
  0x2f   :  { %195 = vmatprep.subr.mxu0 %v285_v0 }
  0x30   :  { %196 = vmatpush3.msra.mxu0 %v46_v11 }
  0x31   :  { %197 = vmatprep.subr.mxu0 %v285_v0 }
  0x32   :  { %198 = vmatpush3.msra.mxu0 %v45_v12 }
  0x33   :  { %199 = vmatprep.subr.mxu0 %v285_v0 }
  0x34   :  { %200 = vmatpush3.msra.mxu0 %v44_v13 }
  0x35   :  { %201 = vmatprep.subr.mxu0 %v285_v0 }
  0x36   :  { %202 = vmatpush3.msra.mxu0 %v43_v14 }
  0x37   :  { %203 = vmatprep.subr.mxu0 %v285_v0 }
  0x38   :  { %204 = vmatpush3.msra.mxu0 %v42_v15 }
  0x39   :  { %206 = vmatmul.mubr.msk.f32.vlgmr.msra.gmra.mxu0 %vm64_vm1, %v41_v16 }
  0xf9   :  { %v134_v18 = vpop.f32.mrf.mxu0 }
  0xfa   :  { %v135_v19 = vadd.f32 %v157_v17, %v134_v18 }
  0xfb   :  { %v207_v20 = vpop.f32.mrf.mxu0 }
  0xfc   :  { %v138_v21 = vmax.f32 %v135_v19, 0.0 }
  0xfe   :  { %140 = vst.msk [vmem:[#allocation7] sm:$0xff] %vm139_vm2, %v138_v21 }
  0xff   :  { %266 = shalt.err (!%p263_p0)
}
 0x100   :  { %150 = dma.vmem_to_hbm [thread:$0]  %s148_s25, 128, %s323_s3, [#allocation4]  }
 0x101   :  { %279 = dma.done.wait [#allocation4], 128  }
 0x102   :  { %280 = vsyncadd [#allocation4], 4294967168 }
 0x103   :  { %154 = vsyncpa [#allocation3], 1 }
 0x104   :  { %155 = vsyncpa [#allocation6], 1 }
 0x105   :  { %156 = vsyncpa [#allocation4], 1 }

</bundles_post_ra>
